<compile_context>
chip_gen: v5e
topology: v5e:2x2
jax: 0.10.0
libtpu: 0.0.40
codegen_flags: <defaults>
</compile_context>

<pallas_src>
import functools

import jax
import jax.numpy as jnp
from jax import lax
from jax.experimental import pallas as pl
from jax.experimental.pallas import tpu as pltpu

_LANE = 128


def _round_up(x, m):
    return (x + m - 1) // m * m


def _real_conv_kernel(*refs, k, tl):
    # k == 1: no halo needed, single dot.
    if k == 1:
        x_ref, w_ref, y_ref = refs
        y_ref[...] = jnp.dot(w_ref[0], x_ref[...],
                             preferred_element_type=jnp.float32).astype(y_ref.dtype)
        return

    x_ref, h_ref, w_ref, y_ref = refs
    # x_ref: (C2p, tl)        current L tile (lane-aligned, read once)
    # h_ref: (C2p, HW)        first HW columns of the next tile (right halo)
    # w_ref: (k, 2*C_out, C2p) per-tap block weights (constant index -> resident)
    # y_ref: (2*C_out, tl)    output tile (lane-dense store)
    cur = x_ref[...]
    # Small aligned window (C2p, tl + HW); ~k x smaller than v1's im2col temp.
    window = jnp.concatenate([cur, h_ref[...]], axis=-1)
    # Weight-stationary accumulation over the k taps (f32 accumulator in vregs).
    acc = jnp.dot(w_ref[0], cur, preferred_element_type=jnp.float32)
    for kh in range(1, k):
        acc = acc + jnp.dot(w_ref[kh], window[:, kh:kh + tl],
                            preferred_element_type=jnp.float32)
    y_ref[...] = acc.astype(y_ref.dtype)


def real_conv(x, weight, *, l_tile=1024, compute_dtype=jnp.float32,
              vmem_budget_bytes=16 * 2**20):
    """x: complex64 (N, C_in, L); weight: float32 (C_out, C_in, k, 2) as nn.Conv2d.

    Returns complex64 (N, C_out, L), matching RealConv.forward(x).
    """
    N, C_in, L = x.shape
    C_out, _, k, _ = weight.shape
    pad_l = (k - 1) // 2

    C2 = 2 * C_in
    C2p = _round_up(C2, 8)          # sublane-align the (real|imag) channel axis
    M = 2 * C_out                   # real-out rows stacked over imag-out rows

    # ---- L tiling: TL is a multiple of the halo width HW (itself a multiple
    # of 128 lanes), sized to the VMEM budget (v7x-safe), never a full-L block.
    HW = _round_up(k - 1, _LANE) if k > 1 else 0
    q = max(HW, _LANE)
    tl = max(q, min(_round_up(l_tile, q), _round_up(L, q)))

    in_bpe = jnp.dtype(compute_dtype).itemsize

    def _vmem_need(tl_):
        body = C2p * tl_ * in_bpe
        halo = C2p * HW * in_bpe
        wgt = k * M * C2p * in_bpe
        out = M * tl_ * 4
        return 2 * (body + halo + wgt + out)     # x2: double-buffered pipeline

    while tl > q and _vmem_need(tl) > vmem_budget_bytes:
        tl = max(q, ((tl // 2) // q) * q)

    num_l = pl.cdiv(L, tl)
    # Pad the L axis to (num_l + 1) tiles when a halo is needed so BOTH the
    # body (TL) and halo (HW) blockings divide the array width exactly; the
    # extra columns are zeros and contribute nothing.
    L_pad = (num_l + 1) * tl if k > 1 else num_l * tl

    # ---- single fused pre-pass: real/imag split onto the channel axis,
    # channel pad to a sublane multiple, left 'same' halo + right/tile pad.
    xr = jnp.real(x).astype(compute_dtype)
    xi = jnp.imag(x).astype(compute_dtype)
    x_cat = jnp.concatenate([xr, xi], axis=1)                          # (N, C2, L)
    x_cat = jnp.pad(x_cat, ((0, 0), (0, C2p - C2),
                            (pad_l, L_pad - pad_l - L)))               # (N, C2p, L_pad)
    # TODO(synk): drop this HBM pre-pass by bitcasting complex64 -> interleaved
    # f32 and deinterleaving / zero-masking the halo columns in-kernel.

    # ---- per-tap block weight (k, 2*C_out, C2p):
    #   rows [:C_out]  (real out): [ W0_kh | W1_kh | 0-pad ]
    #   rows [C_out:]  (imag out): [   0   | W0_kh | 0-pad ]
    w = weight.astype(compute_dtype)
    w0 = jnp.transpose(w[..., 0], (2, 0, 1))          # (k, C_out, C_in)
    w1 = jnp.transpose(w[..., 1], (2, 0, 1))
    top = jnp.concatenate([w0, w1], axis=2)
    bot = jnp.concatenate([jnp.zeros_like(w0), w0], axis=2)
    w_taps = jnp.concatenate([top, bot], axis=1)       # (k, M, C2)
    w_taps = jnp.pad(w_taps, ((0, 0), (0, 0), (0, C2p - C2)))

    kern = functools.partial(_real_conv_kernel, k=k, tl=tl)

    # Body blocks: each input column is DMA'd exactly once.
    in_specs = [pl.BlockSpec((pl.Squeezed(), C2p, tl), lambda n, l: (n, 0, l))]
    operands = [x_cat]
    if k > 1:
        hw_blocks = tl // HW
        # Right halo = first HW columns of the NEXT tile (same HBM array,
        # tiny extra block; avoids any full-L resident slab).
        in_specs.append(pl.BlockSpec((pl.Squeezed(), C2p, HW),
                                     lambda n, l: (n, 0, (l + 1) * hw_blocks)))
        operands.append(x_cat)
    # Weight block index is constant -> fetched once, stays resident. It is
    # only k*M*C2p*4 bytes here, so default double-buffering costs ~nothing
    # (single-buffering it only matters if C_out / k grow large).
    in_specs.append(pl.BlockSpec((k, M, C2p), lambda n, l: (0, 0, 0)))
    operands.append(w_taps)

    # Megacore: shard batches when there are >= 2; otherwise shard L tiles.
    dim_sem = ("parallel", "arbitrary") if N >= 2 else ("parallel", "parallel")

    flops = 2 * N * L * M * k * C2
    bytes_accessed = (in_bpe * (N * C2p * L_pad + N * num_l * C2p * HW
                                + k * M * C2p)
                      + 4 * N * M * num_l * tl)

    y2 = pl.pallas_call(
        kern,
        out_shape=jax.ShapeDtypeStruct((N, M, num_l * tl), jnp.float32),
        grid_spec=pltpu.PrefetchScalarGridSpec(
            num_scalar_prefetch=0,
            grid=(N, num_l),
            in_specs=in_specs,
            out_specs=pl.BlockSpec((pl.Squeezed(), M, tl),
                                   lambda n, l: (n, 0, l)),
        ),
        compiler_params=pltpu.CompilerParams(
            dimension_semantics=dim_sem,
            vmem_limit_bytes=int(max(_vmem_need(tl) + 8 * 2**20, 20 * 2**20)),
        ),
        cost_estimate=pl.CostEstimate(flops=int(flops), transcendentals=0,
                                      bytes_accessed=int(bytes_accessed)),
    )(*operands)

    # Rows [:C_out] are the real part, [C_out:] the imaginary part; the L-pad
    # slice is folded into this single recombination pass.
    return y2[:, :C_out, :L] + 1j * y2[:, C_out:, :L]


def _reference(x, weight):
    """Pure-JAX replica of the PyTorch module (Conv2d (k,2), padding='same')."""
    _, _, k, _ = weight.shape
    pad_l = (k - 1) // 2
    pad_r = (k - 1) - pad_l
    x4 = jnp.stack([jnp.real(x), jnp.imag(x)], axis=-1).astype(jnp.float32)
    # 'same' padding: H -> (pad_l, pad_r), W (size 2, kernel 2) -> (0, 1)
    x4 = jnp.pad(x4, ((0, 0), (0, 0), (pad_l, pad_r), (0, 1)))
    y4 = lax.conv_general_dilated(
        x4, weight.astype(jnp.float32),
        window_strides=(1, 1), padding="VALID",
        dimension_numbers=("NCHW", "OIHW", "NCHW"))
    return y4[:, :, :, 0] + 1j * y4[:, :, :, 1]


if __name__ == "__main__":
    key = jax.random.PRNGKey(0)

    def make_case(k_case, N, C_in, C_out, L, k):
        k1, k2, k3 = jax.random.split(k_case, 3)
        xx = (jax.random.normal(k1, (N, C_in, L), jnp.float32)
              + 1j * jax.random.normal(k2, (N, C_in, L), jnp.float32))
        fan_in = C_in * k * 2
        bound = 1.0 / (fan_in ** 0.5)
        ww = jax.random.uniform(k3, (C_out, C_in, k, 2), jnp.float32, -bound, bound)
        return xx, ww

    ka, kb, kc = jax.random.split(key, 3)

    # 1) Primary small shape (N >= 2: batch-parallel megacore path).
    x, w = make_case(ka, N=2, C_in=4, C_out=4, L=16, k=3)
    y = real_conv(x, w)
    jax.block_until_ready(y)
    assert y.shape == (2, 4, 16) and jnp.iscomplexobj(y)
    assert jnp.allclose(y, _reference(x, w), atol=1e-5, rtol=1e-5)

    # 2) Even k (asymmetric 'same' halo), non-8-aligned channels, N == 1 path.
    x2, w2 = make_case(kb, N=1, C_in=3, C_out=5, L=20, k=4)
    y2 = real_conv(x2, w2)
    jax.block_until_ready(y2)
    assert y2.shape == (1, 5, 20)
    assert jnp.allclose(y2, _reference(x2, w2), atol=1e-5, rtol=1e-5)

    # 3) Multiple L tiles with a ragged tail: exercises the cross-tile halo.
    x3, w3 = make_case(kc, N=2, C_in=3, C_out=2, L=300, k=5)
    y3 = real_conv(x3, w3, l_tile=128)
    jax.block_until_ready(y3)
    assert y3.shape == (2, 2, 300)
    assert jnp.allclose(y3, _reference(x3, w3), atol=1e-5, rtol=1e-5)

    print("KERNEL_OK")
</pallas_src>

<mosaic_0001>
module attributes {stable_mosaic.version = 11 : i64} {
  func.func @_real_conv_kernel(%arg0: i32, %arg1: i32, %arg2: memref<1x8x128xf32, #tpu.memory_space<vmem>>, %arg3: memref<1x8x128xf32, #tpu.memory_space<vmem>>, %arg4: memref<3x8x8xf32, #tpu.memory_space<vmem>>, %arg5: memref<1x8x128xf32, #tpu.memory_space<vmem>>) attributes {dimension_semantics = [#tpu.dimension_semantics<parallel>, #tpu.dimension_semantics<arbitrary>], iteration_bounds = array<i64: 2, 1>, scalar_prefetch = 0 : i64, scratch_operands = 0 : i64, tpu.core_type = #tpu.core_type<tc>, window_params = [{transform_indices = @transform_0, window_bounds = array<i64: 1, 8, 128>}, {transform_indices = @transform_1, window_bounds = array<i64: 1, 8, 128>}, {pipeline_mode = #tpu.pipeline_mode<synchronous>, transform_indices = @transform_2, window_bounds = array<i64: 3, 8, 8>}, {transform_indices = @transform_3, window_bounds = array<i64: 1, 8, 128>}]} {
    %c0 = arith.constant 0 : index
    %c0_0 = arith.constant 0 : index
    %c0_1 = arith.constant 0 : index
    %0 = vector.load %arg2[%c0, %c0_0, %c0_1] : memref<1x8x128xf32, #tpu.memory_space<vmem>>, vector<1x8x128xf32>
    %1 = vector.shape_cast %0 : vector<1x8x128xf32> to vector<8x128xf32>
    %c0_2 = arith.constant 0 : index
    %c0_3 = arith.constant 0 : index
    %c0_4 = arith.constant 0 : index
    %2 = vector.load %arg3[%c0_2, %c0_3, %c0_4] : memref<1x8x128xf32, #tpu.memory_space<vmem>>, vector<1x8x128xf32>
    %3 = vector.shape_cast %2 : vector<1x8x128xf32> to vector<8x128xf32>
    %4 = tpu.concatenate %1, %3 in 1 : vector<8x128xf32>, vector<8x128xf32> -> vector<8x256xf32>
    %c0_5 = arith.constant 0 : index
    %c0_6 = arith.constant 0 : index
    %c0_7 = arith.constant 0 : index
    %5 = vector.load %arg4[%c0_5, %c0_6, %c0_7] : memref<3x8x8xf32, #tpu.memory_space<vmem>>, vector<1x8x8xf32>
    %6 = vector.shape_cast %5 : vector<1x8x8xf32> to vector<8x8xf32>
    %cst = arith.constant dense<0.000000e+00> : vector<8x128xf32>
    %7 = tpu.matmul %6, %1, %cst {dimension_numbers = #tpu.dot_dimension_numbers<[1], [0], [0], [1], [0, 0, 1, 1], [], []>} : vector<8x8xf32>, vector<8x128xf32>, vector<8x128xf32> -> vector<8x128xf32>
    %c1 = arith.constant 1 : index
    %c0_8 = arith.constant 0 : index
    %c0_9 = arith.constant 0 : index
    %8 = vector.load %arg4[%c1, %c0_8, %c0_9] : memref<3x8x8xf32, #tpu.memory_space<vmem>>, vector<1x8x8xf32>
    %9 = vector.shape_cast %8 : vector<1x8x8xf32> to vector<8x8xf32>
    %10 = vector.extract_strided_slice %4 {offsets = [0, 1], sizes = [8, 128], strides = [1, 1]} : vector<8x256xf32> to vector<8x128xf32>
    %cst_10 = arith.constant dense<0.000000e+00> : vector<8x128xf32>
    %11 = tpu.matmul %9, %10, %cst_10 {dimension_numbers = #tpu.dot_dimension_numbers<[1], [0], [0], [1], [0, 0, 1, 1], [], []>} : vector<8x8xf32>, vector<8x128xf32>, vector<8x128xf32> -> vector<8x128xf32>
    %12 = arith.addf %7, %11 : vector<8x128xf32>
    %c2 = arith.constant 2 : index
    %c0_11 = arith.constant 0 : index
    %c0_12 = arith.constant 0 : index
    %13 = vector.load %arg4[%c2, %c0_11, %c0_12] : memref<3x8x8xf32, #tpu.memory_space<vmem>>, vector<1x8x8xf32>
    %14 = vector.shape_cast %13 : vector<1x8x8xf32> to vector<8x8xf32>
    %15 = vector.extract_strided_slice %4 {offsets = [0, 2], sizes = [8, 128], strides = [1, 1]} : vector<8x256xf32> to vector<8x128xf32>
    %cst_13 = arith.constant dense<0.000000e+00> : vector<8x128xf32>
    %16 = tpu.matmul %14, %15, %cst_13 {dimension_numbers = #tpu.dot_dimension_numbers<[1], [0], [0], [1], [0, 0, 1, 1], [], []>} : vector<8x8xf32>, vector<8x128xf32>, vector<8x128xf32> -> vector<8x128xf32>
    %17 = arith.addf %12, %16 : vector<8x128xf32>
    %c0_14 = arith.constant 0 : index
    %c0_15 = arith.constant 0 : index
    %c0_16 = arith.constant 0 : index
    %18 = vector.load %arg5[%c0_14, %c0_15, %c0_16] : memref<1x8x128xf32, #tpu.memory_space<vmem>>, vector<1x8x128xf32>
    %19 = vector.shape_cast %18 : vector<1x8x128xf32> to vector<8x128xf32>
    %20 = vector.shape_cast %17 : vector<8x128xf32> to vector<1x8x128xf32>
    tpu.vector_store %arg5[%c0_14, %c0_15, %c0_16], %20 {strides = array<i32>} : memref<1x8x128xf32, #tpu.memory_space<vmem>>, vector<1x8x128xf32>,
    return
  }
  func.func @transform_0(%arg0: i32, %arg1: i32) -> (i32, i32, i32) {
    %c0_i32 = arith.constant 0 : i32
    %c0_i32_0 = arith.constant 0 : i32
    return %arg0, %c0_i32, %arg1 : i32, i32, i32
  }
  func.func @transform_1(%arg0: i32, %arg1: i32) -> (i32, i32, i32) {
    %c1_i32 = arith.constant 1 : i32
    %0 = arith.addi %arg1, %c1_i32 : i32
    %c1_i32_0 = arith.constant 1 : i32
    %1 = arith.muli %0, %c1_i32_0 : i32
    %c0_i32 = arith.constant 0 : i32
    %c0_i32_1 = arith.constant 0 : i32
    return %arg0, %c0_i32, %1 : i32, i32, i32
  }
  func.func @transform_2(%arg0: i32, %arg1: i32) -> (i32, i32, i32) {
    %c0_i32 = arith.constant 0 : i32
    %c0_i32_0 = arith.constant 0 : i32
    %c0_i32_1 = arith.constant 0 : i32
    %c0_i32_2 = arith.constant 0 : i32
    return %c0_i32, %c0_i32_0, %c0_i32_1 : i32, i32, i32
  }
  func.func @transform_3(%arg0: i32, %arg1: i32) -> (i32, i32, i32) {
    %c0_i32 = arith.constant 0 : i32
    %c0_i32_0 = arith.constant 0 : i32
    return %arg0, %c0_i32, %arg1 : i32, i32, i32
  }
}

</mosaic_0001>

<bundles_post_ra>
// kernel: tpu_custom_call.1
= control target key start
LH: loop header
LB: loop body
LE: loop exit
PB: predicated region body
PF: predicated region fallthrough
CT: control target
= control target key end

     0   :  { %s981_s0 = inlined_call_operand.hbm [shape: f32[2,8,256], index: 0, kind: input, shape index: {}]   ;;  %s982_s1 = inlined_call_operand.hbm [shape: f32[2,8,256], index: 1, kind: input, shape index: {}]   ;;  %s983_s2 = inlined_call_operand.hbm [shape: f32[3,8,8], index: 2, kind: input, shape index: {}]   ;;  %s984_s3 = inlined_call_operand.hbm [shape: f32[2,8,128], index: 3, kind: output, shape index: {}]  }
   0x1   :  { %988 = sst [smem:[#allocation17_spill]] %s983_s2 }
   0x2   :  { %8 = vsyncpa [#allocation3], 0 }
   0x3   :  { %10 = vsyncpa [#allocation3 + $0x1], 0 }
   0x4   :  { %11 = vsyncpa [#allocation6], 0 }
   0x5   :  { %13 = vsyncpa [#allocation6 + $0x1], 0 }
   0x6   :  { %14 = vsyncpa [#allocation4], 0 }
   0x7   :  { %16 = vsyncpa [#allocation4 + $0x1], 0  ;;  %s821_s12 = smov 0   ;;  %s823_s13 = smov 0  }
   0x8   :  { %s825_s14 = smov 0   ;;  %s827_s15 = smov 0  }
   0x9   :  { %s829_s16 = smov 0   ;;  %s831_s17 = smov 0  }
   0xa LB: > { %989 = sst [smem:[#allocation13_spill]] %s782_s14  ;;  %s852_s18 = sadd.s32 4294967295, %s794_s17   ;;  %s794_s17 = sphi %s831_s17, %s22_s17   ;;  %s790_s16 = sphi %s829_s16, %s1002_s16   ;;  %s786_s15 = sphi %s827_s15, %s1001_s15   ;;  %s782_s14 = sphi %s825_s14, %s1000_s14   ;;  %s778_s13 = sphi %s823_s13, %s1004_s13   ;;  %s774_s12 = sphi %s821_s12, %s1003_s12  }
   0xb   : > { %990 = sst [smem:[#allocation14_spill]] %s790_s16  ;;  %p499_p0 = scmp.ge.s32.totalorder %s794_s17, 1 }
   0xc   : > { %p57_p1 = scmp.eq.s32.totalorder %s852_s18, 0  ;;  %p146_p2 = scmp.lt.s32.totalorder %s794_s17, 3 }
   0xd   : > { %s991_s2 = sld [smem:[#allocation17_spill]]  ;;  %s796_s23 = smov [#allocation7]  }
   0xe   : > { %p860_p3 = pnand %p499_p0, %p146_p2  ;;  %s159_s24 = sshll.u32 %s796_s23, 4  ;;  %s160_s24 = int_to_ptr.vmem [resolvable:$true] %s159_s24 }
   0xf   : > { %p501_p6 = scmp.ge.s32.totalorder %s794_s17, 2  ;;  %s797_s25 = smov 128  }
  0x10   : > { %p532_p4 = pneg %p860_p3  ;;  %s798_s26 = smov 8  }
  0x11   : > { %s498_s27 = sadd.s32 4294967294, %s794_s17   ;;  %s34_s28 = sadd.s32 1, %s790_s16 }
  0x12   : > { %p533_p5 = pnand %p532_p4, %p57_p1  ;;  %s43_s29 = sadd.s32 1, %s782_s14 }
  0x13   : > { %s157_s21 = sshll.u32 %s991_s2, 4  ;;  %p36_p7 = scmp.ge.s32.totalorder %s34_s28, 2  ;;  %s158_s21 = int_to_ptr.hbm [resolvable:$true] %s157_s21 }
  0x14   : > { %535 = dma.hbm_to_vmem [thread:$0]  (!%p533_p5), %s158_s21, 384, %s160_s24, [#allocation6], %s797_s25, %s797_s25, %s798_s26  }
  0x15   : > { %p50_p8 = scmp.ne.s32.totalorder %s782_s14, %s778_s13  ;;  %p51_p9 = scmp.eq.s32.totalorder %s794_s17, 0 }
  0x16   : > { %p56_p10 = scmp.ne.s32.totalorder %s778_s13, %s774_s12  ;;  %s1006_s28 = smov (%p36_p7, %s34_s28), 0 }
  0x17   : > { %993 = sst [smem:[#allocation15_spill]] %s1006_s28  ;;  %p879_p11 = por %p51_p9, %p50_p8 }
  0x18   : > { %p885_p12 = por %p57_p1, %p56_p10  ;;  %s38_s5 = ssub.s32 %s790_s16, %s1006_s28 }
  0x19   : > { %p133_p13 = scmp.eq.s32.totalorder %s852_s18, 1  ;;  %p41_p0 = scmp.eq.s32.totalorder %s38_s5, 0 }
  0x1a   : > { %p139_p2 = scmp.eq.s32.totalorder %s498_s27, 1  ;;  %p548_p5 = scmp.lt.s32.totalorder %s794_s17, 2 }
  0x1b   : > { %p892_p4 = por %p133_p13, %p50_p8  ;;  %s173_s9 = sand.u32 1, %s782_s14  }
  0x1c   : > { %s898_s7 = scalar_select %p41_p0, %s782_s14, %s43_s29  }
  0x1d   : > { %p900_p7 = por %p139_p2, %p56_p10  ;;  %s502_s10 = sshll.u32 %s173_s9, 3 }
  0x1e   : > { %997 = sst [smem:[#allocation16_spill]] %s898_s7  ;;  %s520_s11 = sshll.u32 %s790_s16, 4 }
  0x1f   : > { %s183_s21 = scalar_lea.hbm %s981_s0, %s520_s11  ;;  %s177_s23 = scalar_lea.vmem [#allocation2], %s502_s10 }
  0x20   : > { %s187_s24 = sshll.u32 %s177_s23, 4  ;;  %s185_s25 = sshll.u32 %s183_s21, 4  ;;  %s188_s24 = int_to_ptr.vmem [resolvable:$true] %s187_s24  ;;  %s186_s25 = int_to_ptr.hbm [resolvable:$true] %s185_s25 }
  0x21   : > { %p537_p8 = pnand %p548_p5, %p879_p11  ;;  %s421_s29 = scalar_lea.hbm %s982_s1, %s520_s11 }
  0x22   : > { %s194_s5 = sand.u32 1, %s794_s17   ;;  %s174_s2 = scalar_lea.sflag [#allocation3], %s173_s9 }
  0x23   : > { %539 = dma.hbm_to_vmem [thread:$0]  (!%p537_p8), %s186_s25, 128, %s188_s24, %s174_s2  }
  0x24   : > { %s422_s28 = scalar_lea.hbm %s421_s29, 8  ;;  %s198_s7 = scalar_lea.vmem [#allocation5], %s502_s10 }
  0x25   : > { %s207_s16 = sshll.u32 %s422_s28, 4  ;;  %s209_s14 = sshll.u32 %s198_s7, 4  ;;  %s208_s16 = int_to_ptr.hbm [resolvable:$true] %s207_s16  ;;  %s210_s14 = int_to_ptr.vmem [resolvable:$true] %s209_s14 }
  0x26   : > { %s195_s19 = scalar_lea.sflag [#allocation6], %s194_s5  ;;  %218 = sbr.rel (%p860_p3) target bundleno = 312 (0x138), region = 32 }
  0x27   : > { %542 = dma.hbm_to_vmem [thread:$0]  (!%p537_p8), %s208_s16, 128, %s210_s14, %s195_s19  }
  0x28   : > { %s918_s30 = sand.u32 (!%p860_p3), 1, %s778_s13  }
  0x29   : > { %s921_s11 = sshll.u32 (!%p860_p3), %s918_s30, 3  ;;  %s221_s2 = scalar_lea.sflag (!%p860_p3), [#allocation3], %s918_s30 }
  0x2a   : > { %s224_s28 = scalar_lea.vmem (!%p860_p3), [#allocation2], %s921_s11 }
  0x2b   : > { %757 = dma.done.wait (%p885_p12), %s221_s2, 128  }
  0x2c   : > { %759 = vsyncadd (%p885_p12), %s221_s2, 4294967168  ;;  %s230_s14 = sand.u32 1, %s852_s18   ;;  %s234_s22 = scalar_lea.vmem [#allocation5], %s921_s11 }
  0x2d   : > { %s231_s16 = scalar_lea.sflag [#allocation6], %s230_s14 }
  0x2e   : > { %761 = dma.done.wait (%p885_p12), %s231_s16, 128  }
  0x2f   : > { %763 = vsyncadd (%p885_p12), %s231_s16, 4294967168 }
  0x30   : > { %765 = dma.done.wait (%p57_p1), [#allocation6], 384  }
  0x31   : > { %767 = vsyncadd (%p57_p1), [#allocation6], 4294966912  ;;  %v269_v0 = vld [vmem:[%s224_s28] sm:$0xff]  ;;  %v270_v1 = vld [vmem:[%s234_s22] sm:$0xff]  ;;  %s799_s7 = smov 126   ;;  %s800_s9 = smov 127  }
  0x32   : > { %v604_v2 = vpack.i.bf16 %v270_v1, %v269_v0  ;;  %325 = vmatpush.msra.mxu1 %v269_v0  ;;  %vm283_vm0 = vcmask 64512   ;;  %v271_v3 = vld [vmem:[#allocation7] sm:$0xff]  ;;  %vm336_vm1 = vcmask 1031168   ;;  %v331_v7 = vld [vmem:[#allocation7 + $0x10] sm:$0xff]  ;;  %vm280_vm2 = vcmask 1039360   ;;  %v273_v12 = vld [vmem:[#allocation7 + $0x8] sm:$0xff] }
  0x33   : > { %514 = vmatmul.msk.f32.vlgmr.msra.gmra.mxu1 %vm283_vm0, %v271_v3  ;;  %s517_s18 = sshll.u32 %s786_s15, 3  ;;  %s267_s21 = scalar_lea.vmem [#allocation8], %s921_s11 }
  0x34   : > { %605 = vrot.lane.b32.xlu0 %v604_v2, %s799_s7  ;;  %s376_s20 = scalar_lea.hbm %s984_s3, %s517_s18  ;;  %s378_s23 = sshll.u32 %s267_s21, 4  ;;  %s379_s23 = int_to_ptr.vmem [resolvable:$true] %s378_s23 }
  0x35   : > { %s380_s24 = sshll.u32 %s376_s20, 4  ;;  %s365_s25 = scalar_lea.sflag [#allocation4], %s918_s30  ;;  %s381_s24 = int_to_ptr.hbm [resolvable:$true] %s380_s24 }
  0x36   : > { %s718_s26 = sshra.s32 %s381_s24, 4  ;;  %s724_s5 = scalar_lea.hbm %s984_s3, 16  ;;  %s719_s26 = int_to_ptr.hbm [resolvable:$true] %s718_s26 }
  0x37   : > { %s720_s15 = scalar_lea.hbm %s719_s26, 8  ;;  %p725_p10 = scmp.lt.s32.totalorder %s719_s26, %s984_s3 }
  0x38   : > { %p721_p1 = scmp.ne.s32.totalorder %s719_s26, %s720_s15  ;;  %p726_p11 = scmp.lt.s32.totalorder %s724_s5, %s720_s15 }
  0x3a   : > { %p722_p3 = pnand %p721_p1, %p892_p4  ;;  %p727_p12 = por %p726_p11, %p725_p10 }
  0x3c   : > { %610 = vrot.lane.b32.xlu0 %v604_v2, %s800_s9  ;;  %p723_p9 = pneg %p722_p3 }
  0x3e   : > { %p728_p13 = pnand %p727_p12, %p723_p9 }
  0xa6   : > { %v606_v4 = vpop.permute.xlu0 %605 }
  0xa7   : > { %v608_v5 = vunpack.i.h.bf16 %v606_v4  ;;  %v607_v6 = vunpack.i.l.bf16 %v606_v4 }
  0xa9   : > { %v337_v8 = vsel %vm336_vm1, %v607_v6, %v608_v5 }
  0xaa   : > { %357 = vmatpush.msra.mxu2 %v337_v8 }
  0xab   : > { %515 = vmatmul.msk.f32.vlgmr.msra.gmra.mxu2 %vm283_vm0, %v331_v7 }
  0xae   : > { %v611_v9 = vpop.permute.xlu0 %610 }
  0xaf   : > { %v613_v10 = vunpack.i.h.bf16 %v611_v9  ;;  %v612_v11 = vunpack.i.l.bf16 %v611_v9 }
  0xb0   : > { %v327_v14 = vpop.f32.mrf.mxu1 }
  0xb1   : > { %v281_v13 = vsel %vm280_vm2, %v612_v11, %v613_v10 }
  0xb2   : > { %302 = vmatpush.msra.mxu0 %v281_v13 }
  0xb3   : > { %513 = vmatmul.msk.f32.vlgmr.msra.gmra.mxu0 %vm283_vm0, %v273_v12 }
 0x12e   : > { %v359_v16 = vpop.f32.mrf.mxu2 }
 0x130   : > { %v304_v15 = vpop.f32.mrf.mxu0 }
 0x131   : > { %v328_v17 = vadd.f32 %v327_v14, %v304_v15 }
 0x133   : > { %v362_v18 = vadd.f32 %v359_v16, %v328_v17 }
 0x135   : > { %363 = vst [vmem:[%s267_s21] sm:$0xff] %v362_v18 }
 0x136   : > { %731 = shalt.err (!%p728_p13)
}
 0x137   : > { %530 = dma.vmem_to_hbm [thread:$0]  (%p892_p4), %s379_s23, 128, %s381_s24, %s365_s25  }
 0x138 PF: > { %s392_s30 = sand.u32 1, %s774_s12   ;;  %p544_p0 = pnand %p501_p6, %p900_p7 }
 0x139   : > { %s393_s2 = scalar_lea.sflag [#allocation4], %s392_s30 }
 0x13a   : > { %p545_p2 = pneg %p544_p0 }
 0x13c   : > { %769 = dma.done.wait (%p545_p2), %s393_s2, 128  }
 0x13d   : > { %771 = vsyncadd (%p545_p2), %s393_s2, 4294967168  ;;  %s22_s17 = sadd.s32 1, %s794_s17   ;;  %s999_s28 = sld [smem:[#allocation13_spill]] }
 0x13e   : > { %p19_p5 = scmp.ge.s32.totalorder %s22_s17, 4   ;;  %s1000_s14 = sld [smem:[#allocation16_spill]] }
 0x13f   : > { %s1001_s15 = sld [smem:[#allocation14_spill]]  ;;  %s1003_s12 = smov %s778_s13 }
 0x140   : > { %s1002_s16 = sld [smem:[#allocation15_spill]]  ;;  %21 = sbr.rel (!%p19_p5) target bundleno = 10 (0xa), region = 96 }
 0x143   : > { %s1004_s13 = smov %s999_s28 }
 0x145   :  { %399 = vsyncpa [#allocation3], 1 }
 0x146   :  { %401 = vsyncpa [#allocation3 + $0x1], 1 }
 0x147   :  { %402 = vsyncpa [#allocation6], 1 }
 0x148   :  { %404 = vsyncpa [#allocation6 + $0x1], 1 }
 0x149   :  { %405 = vsyncpa [#allocation4], 1 }
 0x14a   :  { %407 = vsyncpa [#allocation4 + $0x1], 1 }

</bundles_post_ra>
